<compile_context>
chip_gen: v5e
topology: v5e:2x2
jax: 0.10.0
libtpu: 0.0.40
codegen_flags: <defaults>
</compile_context>

<pallas_src>
import jax
import jax.numpy as jnp
import numpy as np
from jax.experimental import pallas as pl
from jax.experimental.pallas import tpu as pltpu


def _round_up(n, m):
    return ((n + m - 1) // m) * m


def _cdiv(a, b):
    return -(-a // b)


def _min_sublane(dtype):
    itemsize = jnp.dtype(dtype).itemsize
    return {4: 8, 2: 16, 1: 32}.get(itemsize, 8)


def _block_diag(w, pack):
    """(k, n) -> (pack*k, pack*n) block-diagonal replication of w."""
    if pack == 1:
        return w
    k, n = w.shape
    eye = jnp.eye(pack, dtype=w.dtype)
    return jnp.einsum('pq,kn->pkqn', eye, w).reshape(pack * k, pack * n)


# ----------------------------- Pallas kernel --------------------------------
def encoder_kernel(x_ref, y_ref, w1x_ref, w1y_ref, b1_ref,
                   w2_ref, b2_ref, w3_ref, b3_ref, out_ref):
    wdt = w1x_ref.dtype
    # Layer 1: x @ W1x + y @ W1y + b1  (== concat(x, y) @ W1 + b1), ReLU.
    h = (jnp.dot(x_ref[...].astype(wdt), w1x_ref[...],
                 preferred_element_type=jnp.float32)
         + jnp.dot(y_ref[...].astype(wdt), w1y_ref[...],
                   preferred_element_type=jnp.float32)
         + b1_ref[...])
    h = jnp.maximum(h, 0.0)
    # Layer 2: Linear + ReLU (f32 accumulate and f32 elementwise tail).
    h = (jnp.dot(h.astype(wdt), w2_ref[...],
                 preferred_element_type=jnp.float32) + b2_ref[...])
    h = jnp.maximum(h, 0.0)
    # Layer 3: representation head.
    out_ref[...] = (jnp.dot(h.astype(wdt), w3_ref[...],
                            preferred_element_type=jnp.float32)
                    + b3_ref[...]).astype(out_ref.dtype)


# ------------------------------ Wrapper --------------------------------------
def encoder_forward(x, y, params, *, batch_tile=2048,
                    mxu_dtype=None, out_dtype=jnp.float32):
    """x: (B, x_dim), y: (B, y_dim) -> r: (B, r_dim)."""
    w1, b1, w2, b2, w3, b3 = params
    B, x_dim = x.shape
    y_dim = y.shape[1]
    in_dim, h_dim = w1.shape
    assert in_dim == x_dim + y_dim
    r_dim = w3.shape[1]
    if mxu_dtype is None:
        mxu_dtype = w1.dtype

    # Split W1 so the concat never materializes in HBM.
    w1x = w1[:x_dim].astype(mxu_dtype)
    w1y = w1[x_dim:].astype(mxu_dtype)
    w2m = w2.astype(mxu_dtype)
    w3m = w3.astype(mxu_dtype)
    b1f = jnp.asarray(b1, jnp.float32).reshape(1, h_dim)
    b2f = jnp.asarray(b2, jnp.float32).reshape(1, h_dim)
    b3f = jnp.asarray(b3, jnp.float32).reshape(1, r_dim)

    # --- lane-dense row packing ----------------------------------------------
    # Fold `pack` consecutive batch rows onto the lane axis (free row-major
    # reshape) and use block-diagonal weights so the output lane width becomes
    # pack * r_dim == 128 (unmasked stores, full-width VPU tail).
    pack = 128 // r_dim if (0 < r_dim < 128 and 128 % r_dim == 0) else 1
    if pack > 1 and B % pack == 0:
        xk = x.reshape(B // pack, pack * x_dim)
        yk = y.reshape(B // pack, pack * y_dim)
        w1x = _block_diag(w1x, pack)
        w1y = _block_diag(w1y, pack)
        w2m = _block_diag(w2m, pack)
        w3m = _block_diag(w3m, pack)
        b1f = jnp.tile(b1f, (1, pack))
        b2f = jnp.tile(b2f, (1, pack))
        b3f = jnp.tile(b3f, (1, pack))
    else:
        pack = 1
        xk, yk = x, y

    rows = B // pack
    xd, yd = xk.shape[1], yk.shape[1]
    hd, rd = pack * h_dim, pack * r_dim

    # Tile selection: multiple of the sublane requirement, >=2 grid steps when
    # possible (v7x has 2 TensorCores), collapse to a single full-extent block
    # for tiny batches (legal: block dim == full array dim).
    sublane = max(_min_sublane(xk.dtype), _min_sublane(yk.dtype),
                  _min_sublane(out_dtype))
    if rows <= sublane:
        tile = rows
    else:
        tile = max(sublane,
                   min(_round_up(max(batch_tile // pack, 1), sublane),
                       _round_up(_cdiv(rows, 2), sublane)))
    grid = (_cdiv(rows, tile),)   # ragged last block handled by Pallas

    rep = lambda shape: pl.BlockSpec(shape, lambda i: (0, 0))  # replicated

    cost = pl.CostEstimate(
        flops=2 * rows * (xd * hd + yd * hd + hd * hd + hd * rd),
        transcendentals=0,
        bytes_accessed=(rows * (xd * jnp.dtype(xk.dtype).itemsize
                                + yd * jnp.dtype(yk.dtype).itemsize)
                        + (xd * hd + yd * hd + hd * hd + hd * rd)
                        * jnp.dtype(mxu_dtype).itemsize
                        + rows * rd * jnp.dtype(out_dtype).itemsize),
    )

    out = pl.pallas_call(
        encoder_kernel,
        out_shape=jax.ShapeDtypeStruct((rows, rd), out_dtype),
        grid_spec=pltpu.PrefetchScalarGridSpec(
            num_scalar_prefetch=0,
            grid=grid,
            in_specs=[
                pl.BlockSpec((tile, xd), lambda i: (i, 0)),
                pl.BlockSpec((tile, yd), lambda i: (i, 0)),
                rep((xd, hd)), rep((yd, hd)), rep((1, hd)),
                rep((hd, hd)), rep((1, hd)),
                rep((hd, rd)), rep((1, rd)),
            ],
            out_specs=pl.BlockSpec((tile, rd), lambda i: (i, 0)),
        ),
        compiler_params=pltpu.CompilerParams(
            dimension_semantics=("parallel",)),
        cost_estimate=cost,
    )(xk, yk, w1x, w1y, b1f, w2m, b2f, w3m, b3f)

    # Free (row-major/bitcast) reshape back to (B, r_dim) in packed mode.
    return out.reshape(B, r_dim) if pack > 1 else out


# ------------------------- Parameter initialization ---------------------------
def init_params(key, x_dim, y_dim, h_dim, r_dim):
    ks = jax.random.split(key, 5)
    scale1 = 1.0 / np.sqrt(x_dim + y_dim)
    scale2 = 1.0 / np.sqrt(h_dim)
    # Weights stored as (in, out), i.e. already transposed vs. nn.Linear.weight.
    w1 = jax.random.uniform(ks[0], (x_dim + y_dim, h_dim), jnp.float32,
                            -scale1, scale1)
    b1 = jax.random.uniform(ks[1], (1, h_dim), jnp.float32, -scale1, scale1)
    b2 = jax.random.uniform(ks[3], (1, h_dim), jnp.float32, -scale2, scale2)
    w2 = jax.random.uniform(ks[2], (h_dim, h_dim), jnp.float32, -scale2, scale2)
    w3 = jax.random.uniform(ks[4], (h_dim, r_dim), jnp.float32, -scale2, scale2)
    b3 = jnp.zeros((1, r_dim), jnp.float32)
    return (w1, b1, w2, b2, w3, b3)


def reference_forward(x, y, params):
    w1, b1, w2, b2, w3, b3 = params
    xy = jnp.concatenate([x, y], axis=1)
    h = jnp.maximum(xy @ w1 + b1, 0.0)
    h = jnp.maximum(h @ w2 + b2, 0.0)
    return h @ w3 + b3


if __name__ == "__main__":
    # Small shapes consistent with the module: Encoder(x_dim=4, y_dim=4, rs_dim=32)
    batch, x_dim, y_dim = 16, 4, 4
    rs_dim = (32, 1)                      # rs_dim normalized as in __init__
    r_dim = int(np.prod(rs_dim))
    h_dim = 32

    key = jax.random.PRNGKey(0)
    kx, ky, kp = jax.random.split(key, 3)
    x = jax.random.normal(kx, (batch, x_dim), jnp.float32)
    y = jax.random.normal(ky, (batch, y_dim), jnp.float32)
    params = init_params(kp, x_dim, y_dim, h_dim, r_dim)

    # Default f32 path (lane-dense packed layout since B % 4 == 0).
    r = encoder_forward(x, y, params)
    jax.block_until_ready(r)
    r_ref = reference_forward(x, y, params)
    np.testing.assert_allclose(np.asarray(r), np.asarray(r_ref),
                               rtol=1e-5, atol=1e-5)
    assert r.shape == (batch, r_dim)

    # Ragged batch: exercises the unpacked fallback + cdiv grid with a partial
    # boundary block (no wrapper pad / slice).
    xb = jax.random.normal(kx, (13, x_dim), jnp.float32)
    yb = jax.random.normal(ky, (13, y_dim), jnp.float32)
    rb = encoder_forward(xb, yb, params)
    jax.block_until_ready(rb)
    np.testing.assert_allclose(
        np.asarray(rb), np.asarray(reference_forward(xb, yb, params)),
        rtol=1e-5, atol=1e-5)

    # bf16 MXU-operand path (valid on v5e / v6e / v7x; f32 accumulation,
    # looser tolerance).
    rb16 = encoder_forward(x, y, params, mxu_dtype=jnp.bfloat16)
    jax.block_until_ready(rb16)
    np.testing.assert_allclose(np.asarray(rb16), np.asarray(r_ref),
                               rtol=3e-2, atol=3e-2)

    # TODO(synk): base class forward is abstract; this implements the canonical
    # concrete MLP encoder from the upstream neural-processes repo.
    print("KERNEL_OK")
</pallas_src>

<mosaic_0001>
module attributes {stable_mosaic.version = 11 : i64} {
  func.func @encoder_kernel(%arg0: i32, %arg1: memref<4x16xf32, #tpu.memory_space<vmem>>, %arg2: memref<4x16xf32, #tpu.memory_space<vmem>>, %arg3: memref<16x128xf32, #tpu.memory_space<vmem>>, %arg4: memref<16x128xf32, #tpu.memory_space<vmem>>, %arg5: memref<1x128xf32, #tpu.memory_space<vmem>>, %arg6: memref<128x128xf32, #tpu.memory_space<vmem>>, %arg7: memref<1x128xf32, #tpu.memory_space<vmem>>, %arg8: memref<128x128xf32, #tpu.memory_space<vmem>>, %arg9: memref<1x128xf32, #tpu.memory_space<vmem>>, %arg10: memref<4x128xf32, #tpu.memory_space<vmem>>) attributes {dimension_semantics = [#tpu.dimension_semantics<parallel>], iteration_bounds = array<i64: 1>, scalar_prefetch = 0 : i64, scratch_operands = 0 : i64, tpu.core_type = #tpu.core_type<tc>, window_params = [{transform_indices = @transform_0, window_bounds = array<i64: 4, 16>}, {transform_indices = @transform_1, window_bounds = array<i64: 4, 16>}, {pipeline_mode = #tpu.pipeline_mode<synchronous>, transform_indices = @transform_2, window_bounds = array<i64: 16, 128>}, {pipeline_mode = #tpu.pipeline_mode<synchronous>, transform_indices = @transform_3, window_bounds = array<i64: 16, 128>}, {pipeline_mode = #tpu.pipeline_mode<synchronous>, transform_indices = @transform_4, window_bounds = array<i64: 1, 128>}, {pipeline_mode = #tpu.pipeline_mode<synchronous>, transform_indices = @transform_5, window_bounds = array<i64: 128, 128>}, {pipeline_mode = #tpu.pipeline_mode<synchronous>, transform_indices = @transform_6, window_bounds = array<i64: 1, 128>}, {pipeline_mode = #tpu.pipeline_mode<synchronous>, transform_indices = @transform_7, window_bounds = array<i64: 128, 128>}, {pipeline_mode = #tpu.pipeline_mode<synchronous>, transform_indices = @transform_8, window_bounds = array<i64: 1, 128>}, {transform_indices = @transform_9, window_bounds = array<i64: 4, 128>}]} {
    %c0 = arith.constant 0 : index
    %c0_0 = arith.constant 0 : index
    %0 = vector.load %arg1[%c0, %c0_0] : memref<4x16xf32, #tpu.memory_space<vmem>>, vector<4x16xf32>
    %c0_1 = arith.constant 0 : index
    %c0_2 = arith.constant 0 : index
    %1 = vector.load %arg3[%c0_1, %c0_2] : memref<16x128xf32, #tpu.memory_space<vmem>>, vector<16x128xf32>
    %cst = arith.constant dense<0.000000e+00> : vector<4x128xf32>
    %2 = tpu.matmul %0, %1, %cst {dimension_numbers = #tpu.dot_dimension_numbers<[1], [0], [0], [1], [0, 0, 1, 1], [], []>} : vector<4x16xf32>, vector<16x128xf32>, vector<4x128xf32> -> vector<4x128xf32>
    %c0_3 = arith.constant 0 : index
    %c0_4 = arith.constant 0 : index
    %3 = vector.load %arg2[%c0_3, %c0_4] : memref<4x16xf32, #tpu.memory_space<vmem>>, vector<4x16xf32>
    %c0_5 = arith.constant 0 : index
    %c0_6 = arith.constant 0 : index
    %4 = vector.load %arg4[%c0_5, %c0_6] : memref<16x128xf32, #tpu.memory_space<vmem>>, vector<16x128xf32>
    %cst_7 = arith.constant dense<0.000000e+00> : vector<4x128xf32>
    %5 = tpu.matmul %3, %4, %cst_7 {dimension_numbers = #tpu.dot_dimension_numbers<[1], [0], [0], [1], [0, 0, 1, 1], [], []>} : vector<4x16xf32>, vector<16x128xf32>, vector<4x128xf32> -> vector<4x128xf32>
    %6 = arith.addf %2, %5 : vector<4x128xf32>
    %c0_8 = arith.constant 0 : index
    %c0_9 = arith.constant 0 : index
    %7 = vector.load %arg5[%c0_8, %c0_9] : memref<1x128xf32, #tpu.memory_space<vmem>>, vector<1x128xf32>
    %8 = vector.broadcast %7 : vector<1x128xf32> to vector<4x128xf32>
    %9 = arith.addf %6, %8 : vector<4x128xf32>
    %cst_10 = arith.constant 0.000000e+00 : f32
    %10 = vector.broadcast %cst_10 : f32 to vector<4x128xf32>
    %11 = arith.maximumf %9, %10 : vector<4x128xf32>
    %c0_11 = arith.constant 0 : index
    %c0_12 = arith.constant 0 : index
    %12 = vector.load %arg6[%c0_11, %c0_12] : memref<128x128xf32, #tpu.memory_space<vmem>>, vector<128x128xf32>
    %cst_13 = arith.constant dense<0.000000e+00> : vector<4x128xf32>
    %13 = tpu.matmul %11, %12, %cst_13 {dimension_numbers = #tpu.dot_dimension_numbers<[1], [0], [0], [1], [0, 0, 1, 1], [], []>} : vector<4x128xf32>, vector<128x128xf32>, vector<4x128xf32> -> vector<4x128xf32>
    %c0_14 = arith.constant 0 : index
    %c0_15 = arith.constant 0 : index
    %14 = vector.load %arg7[%c0_14, %c0_15] : memref<1x128xf32, #tpu.memory_space<vmem>>, vector<1x128xf32>
    %15 = vector.broadcast %14 : vector<1x128xf32> to vector<4x128xf32>
    %16 = arith.addf %13, %15 : vector<4x128xf32>
    %cst_16 = arith.constant 0.000000e+00 : f32
    %17 = vector.broadcast %cst_16 : f32 to vector<4x128xf32>
    %18 = arith.maximumf %16, %17 : vector<4x128xf32>
    %c0_17 = arith.constant 0 : index
    %c0_18 = arith.constant 0 : index
    %19 = vector.load %arg8[%c0_17, %c0_18] : memref<128x128xf32, #tpu.memory_space<vmem>>, vector<128x128xf32>
    %cst_19 = arith.constant dense<0.000000e+00> : vector<4x128xf32>
    %20 = tpu.matmul %18, %19, %cst_19 {dimension_numbers = #tpu.dot_dimension_numbers<[1], [0], [0], [1], [0, 0, 1, 1], [], []>} : vector<4x128xf32>, vector<128x128xf32>, vector<4x128xf32> -> vector<4x128xf32>
    %c0_20 = arith.constant 0 : index
    %c0_21 = arith.constant 0 : index
    %21 = vector.load %arg9[%c0_20, %c0_21] : memref<1x128xf32, #tpu.memory_space<vmem>>, vector<1x128xf32>
    %22 = vector.broadcast %21 : vector<1x128xf32> to vector<4x128xf32>
    %23 = arith.addf %20, %22 : vector<4x128xf32>
    %c0_22 = arith.constant 0 : index
    %c0_23 = arith.constant 0 : index
    %24 = vector.load %arg10[%c0_22, %c0_23] : memref<4x128xf32, #tpu.memory_space<vmem>>, vector<4x128xf32>
    tpu.vector_store %arg10[%c0_22, %c0_23], %23 {strides = array<i32>} : memref<4x128xf32, #tpu.memory_space<vmem>>, vector<4x128xf32>,
    return
  }
  func.func @transform_0(%arg0: i32) -> (i32, i32) {
    %c0_i32 = arith.constant 0 : i32
    %c0_i32_0 = arith.constant 0 : i32
    return %arg0, %c0_i32 : i32, i32
  }
  func.func @transform_1(%arg0: i32) -> (i32, i32) {
    %c0_i32 = arith.constant 0 : i32
    %c0_i32_0 = arith.constant 0 : i32
    return %arg0, %c0_i32 : i32, i32
  }
  func.func @transform_2(%arg0: i32) -> (i32, i32) {
    %c0_i32 = arith.constant 0 : i32
    %c0_i32_0 = arith.constant 0 : i32
    %c0_i32_1 = arith.constant 0 : i32
    return %c0_i32, %c0_i32_0 : i32, i32
  }
  func.func @transform_3(%arg0: i32) -> (i32, i32) {
    %c0_i32 = arith.constant 0 : i32
    %c0_i32_0 = arith.constant 0 : i32
    %c0_i32_1 = arith.constant 0 : i32
    return %c0_i32, %c0_i32_0 : i32, i32
  }
  func.func @transform_4(%arg0: i32) -> (i32, i32) {
    %c0_i32 = arith.constant 0 : i32
    %c0_i32_0 = arith.constant 0 : i32
    %c0_i32_1 = arith.constant 0 : i32
    return %c0_i32, %c0_i32_0 : i32, i32
  }
  func.func @transform_5(%arg0: i32) -> (i32, i32) {
    %c0_i32 = arith.constant 0 : i32
    %c0_i32_0 = arith.constant 0 : i32
    %c0_i32_1 = arith.constant 0 : i32
    return %c0_i32, %c0_i32_0 : i32, i32
  }
  func.func @transform_6(%arg0: i32) -> (i32, i32) {
    %c0_i32 = arith.constant 0 : i32
    %c0_i32_0 = arith.constant 0 : i32
    %c0_i32_1 = arith.constant 0 : i32
    return %c0_i32, %c0_i32_0 : i32, i32
  }
  func.func @transform_7(%arg0: i32) -> (i32, i32) {
    %c0_i32 = arith.constant 0 : i32
    %c0_i32_0 = arith.constant 0 : i32
    %c0_i32_1 = arith.constant 0 : i32
    return %c0_i32, %c0_i32_0 : i32, i32
  }
  func.func @transform_8(%arg0: i32) -> (i32, i32) {
    %c0_i32 = arith.constant 0 : i32
    %c0_i32_0 = arith.constant 0 : i32
    %c0_i32_1 = arith.constant 0 : i32
    return %c0_i32, %c0_i32_0 : i32, i32
  }
  func.func @transform_9(%arg0: i32) -> (i32, i32) {
    %c0_i32 = arith.constant 0 : i32
    %c0_i32_0 = arith.constant 0 : i32
    return %arg0, %c0_i32 : i32, i32
  }
}

</mosaic_0001>

<bundles_post_ra>
// kernel: tpu_custom_call.1
= control target key start
LH: loop header
LB: loop body
LE: loop exit
PB: predicated region body
PF: predicated region fallthrough
CT: control target
= control target key end

     0   :  { %14 = vsyncpa [#allocation3], 0  ;;  %s565_s0 = inlined_call_operand.hbm [shape: f32[4,16], index: 0, kind: input, shape index: {}]   ;;  %s566_s1 = inlined_call_operand.hbm [shape: f32[4,16], index: 1, kind: input, shape index: {}]   ;;  %s567_s2 = inlined_call_operand.hbm [shape: f32[16,128], index: 2, kind: input, shape index: {}]   ;;  %s568_s3 = inlined_call_operand.hbm [shape: f32[16,128], index: 3, kind: input, shape index: {}]   ;;  %s569_s4 = inlined_call_operand.vmem [shape: f32[1,128], index: 4, kind: input, shape index: {}]   ;;  %s570_s5 = inlined_call_operand.hbm [shape: f32[128,128], index: 5, kind: input, shape index: {}]   ;;  %s571_s6 = inlined_call_operand.vmem [shape: f32[1,128], index: 6, kind: input, shape index: {}]   ;;  %s572_s7 = inlined_call_operand.hbm [shape: f32[128,128], index: 7, kind: input, shape index: {}]   ;;  %s573_s8 = inlined_call_operand.vmem [shape: f32[1,128], index: 8, kind: input, shape index: {}]   ;;  %s574_s9 = inlined_call_operand.hbm [shape: f32[4,128], index: 9, kind: output, shape index: {}]  }
   0x1   :  { %15 = vsyncpa [#allocation6], 0 }
   0x2   :  { %16 = vsyncpa [#allocation9], 0 }
   0x3   :  { %17 = vsyncpa [#allocation12], 0  ;;  %s35_s11 = sshll.u32 %s566_s1, 4  ;;  %s36_s11 = int_to_ptr.hbm [resolvable:$true] %s35_s11 }
   0x4   :  { %18 = vsyncpa [#allocation4], 0  ;;  %s476_s12 = smov [#allocation5]   ;;  %s58_s16 = sshll.u32 %s568_s3, 4  ;;  %s59_s16 = int_to_ptr.hbm [resolvable:$true] %s58_s16 }
   0x5   :  { %s37_s13 = sshll.u32 %s476_s12, 4  ;;  %s477_s17 = smov [#allocation8]   ;;  %s38_s13 = int_to_ptr.vmem [resolvable:$true] %s37_s13 }
   0x6   :  { %40 = dma.hbm_to_vmem [thread:$0]  %s36_s11, 64, %s38_s13, [#allocation6]  }
   0x7   :  { %s60_s18 = sshll.u32 %s477_s17, 4  ;;  %s24_s21 = sshll.u32 %s565_s0, 4  ;;  %s61_s18 = int_to_ptr.vmem [resolvable:$true] %s60_s18  ;;  %s25_s21 = int_to_ptr.hbm [resolvable:$true] %s24_s21 }
   0x8   :  { %s478_s1 = smov 128   ;;  %s479_s22 = smov 8  }
   0x9   :  { %66 = dma.hbm_to_vmem [thread:$0]  %s59_s16, 256, %s61_s18, [#allocation9], %s478_s1, %s478_s1, %s479_s22  }
   0xa   :  { %s45_s25 = sshll.u32 %s567_s2, 4  ;;  %s480_s26 = smov [#allocation2]   ;;  %s46_s25 = int_to_ptr.hbm [resolvable:$true] %s45_s25 }
   0xb   :  { %s26_s27 = sshll.u32 %s480_s26, 4  ;;  %s481_s3 = smov [#allocation7]   ;;  %s27_s27 = int_to_ptr.vmem [resolvable:$true] %s26_s27 }
   0xc   :  { %29 = dma.hbm_to_vmem [thread:$0]  %s25_s21, 64, %s27_s27, [#allocation3]  }
   0xd   :  { %s47_s28 = sshll.u32 %s481_s3, 4  ;;  %s73_s0 = sshll.u32 %s570_s5, 4  ;;  %s48_s28 = int_to_ptr.vmem [resolvable:$true] %s47_s28  ;;  %s74_s0 = int_to_ptr.hbm [resolvable:$true] %s73_s0 }
   0xe   :  { %53 = dma.hbm_to_vmem [thread:$0]  %s46_s25, 256, %s48_s28, [#allocation6], %s478_s1, %s478_s1, %s479_s22  }
   0xf   :  { %s88_s12 = sshll.u32 %s572_s7, 4  ;;  %s482_s13 = smov [#allocation10]   ;;  %s89_s12 = int_to_ptr.hbm [resolvable:$true] %s88_s12 }
  0x10   :  { %s75_s2 = sshll.u32 %s482_s13, 4  ;;  %s483_s14 = smov [#allocation11]   ;;  %s76_s2 = int_to_ptr.vmem [resolvable:$true] %s75_s2 }
  0x11   :  { %81 = dma.hbm_to_vmem [thread:$0]  %s74_s0, 2048, %s76_s2, [#allocation9], %s478_s1, %s478_s1, %s479_s22  }
  0x12   :  { %s90_s15 = sshll.u32 %s483_s14, 4  ;;  %s91_s15 = int_to_ptr.vmem [resolvable:$true] %s90_s15 }
  0x13   :  { %96 = dma.hbm_to_vmem [thread:$0]  %s89_s12, 2048, %s91_s15, [#allocation12], %s478_s1, %s478_s1, %s479_s22  }
  0x14   :  { %466 = dma.done.wait [#allocation3], 64  }
  0x15   :  { %467 = vsyncadd [#allocation3], 4294967232 }
  0x16   :  { %468 = dma.done.wait [#allocation6], 320  }
  0x17   :  { %469 = vsyncadd [#allocation6], 4294966976 }
  0x18   :  { %470 = dma.done.wait [#allocation9], 2304  }
  0x19   :  { %471 = vsyncadd [#allocation9], 4294964992 }
  0x1a   :  { %472 = dma.done.wait [#allocation12], 2048  }
  0x1b   :  { %473 = vsyncadd [#allocation12], 4294965248  ;;  %v128_v0 = vld [vmem:[#allocation8 + $0x8] sm:$0xff]  ;;  %v125_v1 = vld [vmem:[#allocation7 + $0x8] sm:$0xff]  ;;  %vm129_vm0 = vcmask 130048   ;;  %s484_s19 = smov [#allocation13]  }
  0x1c   :  { %v127_v2 = vld [vmem:[#allocation8] sm:$0xff]  ;;  %147 = vmatpush.msra.mxu0 %v128_v0  ;;  %170 = vmatpush.msra.mxu1 %v125_v1  ;;  %v124_v3 = vld [vmem:[#allocation7] sm:$0xff]  ;;  %v126_v4 = vld [vmem:[#allocation5] sm:$0xf]  ;;  %s269_s20 = sshll.u32 %s484_s19, 4  ;;  %s271_s22 = sshll.u32 %s574_s9, 4  ;;  %s270_s20 = int_to_ptr.vmem [resolvable:$true] %s269_s20  ;;  %s272_s22 = int_to_ptr.hbm [resolvable:$true] %s271_s22 }
  0x1d   :  { %v123_v5 = vld [vmem:[#allocation2] sm:$0xf]  ;;  %v196_v7 = vld [vmem:[#allocation10 + $0x70] sm:$0xff]  ;;  %v195_v8 = vld [vmem:[#allocation10 + $0x68] sm:$0xff] }
  0x1e   :  { %v197_v6 = vld [vmem:[#allocation10 + $0x78] sm:$0xff]  ;;  %148 = vmatpush.msra.mxu0 %v127_v2  ;;  %171 = vmatpush.msra.mxu1 %v124_v3  ;;  %v194_v9 = vld [vmem:[#allocation10 + $0x60] sm:$0xff]  ;;  %v192_v11 = vld [vmem:[#allocation10 + $0x50] sm:$0xff] }
  0x1f   :  { %284 = vmatmul.msk.f32.vlgmr.msra.gmra.mxu0 %vm129_vm0, %v126_v4  ;;  %285 = vmatmul.msk.f32.vlgmr.msra.gmra.mxu1 %vm129_vm0, %v123_v5  ;;  %v193_v10 = vld [vmem:[#allocation10 + $0x58] sm:$0xff]  ;;  %v191_v12 = vld [vmem:[#allocation10 + $0x48] sm:$0xff]  ;;  %v190_v13 = vld [vmem:[#allocation10 + $0x40] sm:$0xff] }
  0x20   :  { %202 = vmatpush.msra.mxu2 %v197_v6  ;;  %v189_v14 = vld [vmem:[#allocation10 + $0x38] sm:$0xff]  ;;  %v188_v15 = vld [vmem:[#allocation10 + $0x30] sm:$0xff]  ;;  %v187_v16 = vld [vmem:[#allocation10 + $0x28] sm:$0xff] }
  0x21   :  { %v186_v17 = vld [vmem:[#allocation10 + $0x20] sm:$0xff]  ;;  %v185_v18 = vld [vmem:[#allocation10 + $0x18] sm:$0xff]  ;;  %v184_v19 = vld [vmem:[#allocation10 + $0x10] sm:$0xff] }
  0x22   :  { %203 = vmatpush.msra.mxu2 %v196_v7  ;;  %v183_v20 = vld [vmem:[#allocation10 + $0x8] sm:$0xff]  ;;  %v182_v21 = vld [vmem:[#allocation10] sm:$0xff]  ;;  %v238_v22 = vld [vmem:[#allocation11 + $0x78] sm:$0xff] }
  0x23   :  { %v237_v23 = vld [vmem:[#allocation11 + $0x70] sm:$0xff]  ;;  %243 = vmatpush.msra.mxu3 %v238_v22  ;;  %v236_v24 = vld [vmem:[#allocation11 + $0x68] sm:$0xff]  ;;  %v235_v25 = vld [vmem:[#allocation11 + $0x60] sm:$0xff] }
  0x24   :  { %204 = vmatpush.msra.mxu2 %v195_v8  ;;  %v234_v26 = vld [vmem:[#allocation11 + $0x58] sm:$0xff]  ;;  %v233_v27 = vld [vmem:[#allocation11 + $0x50] sm:$0xff]  ;;  %v232_v28 = vld [vmem:[#allocation11 + $0x48] sm:$0xff] }
  0x25   :  { %244 = vmatpush.msra.mxu3 %v237_v23  ;;  %v231_v29 = vld [vmem:[#allocation11 + $0x40] sm:$0xff]  ;;  %v230_v30 = vld [vmem:[#allocation11 + $0x38] sm:$0xff]  ;;  %v229_v31 = vld [vmem:[#allocation11 + $0x30] sm:$0xff] }
  0x26   :  { %205 = vmatpush.msra.mxu2 %v194_v9  ;;  %v228_v32 = vld [vmem:[#allocation11 + $0x28] sm:$0xff]  ;;  %v227_v33 = vld [vmem:[#allocation11 + $0x20] sm:$0xff]  ;;  %v226_v34 = vld [vmem:[#allocation11 + $0x18] sm:$0xff] }
  0x27   :  { %245 = vmatpush.msra.mxu3 %v236_v24  ;;  %v295_v35 = vld [vmem:[%s569_s4] ss:$0 sm:$0xff]  ;;  %v225_v41 = vld [vmem:[#allocation11 + $0x10] sm:$0xff]  ;;  %v224_v42 = vld [vmem:[#allocation11 + $0x8] sm:$0xff] }
  0x28   :  { %206 = vmatpush.msra.mxu2 %v193_v10  ;;  %v223_v43 = vld [vmem:[#allocation11] sm:$0xff]  ;;  %v296_v44 = vld [vmem:[%s571_s6] ss:$0 sm:$0xff] }
  0x29   :  { %246 = vmatpush.msra.mxu3 %v235_v25  ;;  %v297_v48 = vld [vmem:[%s573_s8] ss:$0 sm:$0xff] }
  0x2a   :  { %207 = vmatpush.msra.mxu2 %v192_v11 }
  0x2b   :  { %247 = vmatpush.msra.mxu3 %v234_v26 }
  0x2c   :  { %208 = vmatpush.msra.mxu2 %v191_v12 }
  0x2d   :  { %248 = vmatpush.msra.mxu3 %v233_v27 }
  0x2e   :  { %209 = vmatpush.msra.mxu2 %v190_v13 }
  0x2f   :  { %249 = vmatpush.msra.mxu3 %v232_v28 }
  0x30   :  { %210 = vmatpush.msra.mxu2 %v189_v14 }
  0x31   :  { %250 = vmatpush.msra.mxu3 %v231_v29 }
  0x32   :  { %211 = vmatpush.msra.mxu2 %v188_v15 }
  0x33   :  { %251 = vmatpush.msra.mxu3 %v230_v30 }
  0x34   :  { %212 = vmatpush.msra.mxu2 %v187_v16 }
  0x35   :  { %252 = vmatpush.msra.mxu3 %v229_v31 }
  0x36   :  { %213 = vmatpush.msra.mxu2 %v186_v17 }
  0x37   :  { %253 = vmatpush.msra.mxu3 %v228_v32 }
  0x38   :  { %214 = vmatpush.msra.mxu2 %v185_v18 }
  0x39   :  { %254 = vmatpush.msra.mxu3 %v227_v33 }
  0x3a   :  { %215 = vmatpush.msra.mxu2 %v184_v19 }
  0x3b   :  { %255 = vmatpush.msra.mxu3 %v226_v34 }
  0x3c   :  { %216 = vmatpush.msra.mxu2 %v183_v20 }
  0x3d   :  { %256 = vmatpush.msra.mxu3 %v225_v41 }
  0x3e   :  { %217 = vmatpush.msra.mxu2 %v182_v21 }
  0x3f   :  { %257 = vmatpush.msra.mxu3 %v224_v42 }
  0x41   :  { %258 = vmatpush.msra.mxu3 %v223_v43 }
  0x9c   :  { %v150_v36 = vpop.f32.mrf.mxu0  ;;  %v173_v37 = vpop.f32.mrf.mxu1 }
  0x9d   :  { %v174_v38 = vadd.f32 %v173_v37, %v150_v36 }
  0x9f   :  { %v180_v39 = vadd.f32 %v295_v35, %v174_v38 }
  0xa1   :  { %v181_v40 = vmax.f32 %v180_v39, 0.0 }
  0xa3   :  { %218 = vmatmul.f32.vlgmr.msra.gmra.mxu2 %v181_v40 }
 0x126   :  { %v219_v45 = vpop.f32.mrf.mxu2 }
 0x127   :  { %v220_v46 = vadd.f32 %v296_v44, %v219_v45 }
 0x129   :  { %v222_v47 = vmax.f32 %v220_v46, 0.0 }
 0x12b   :  { %259 = vmatmul.f32.vlgmr.msra.gmra.mxu3 %v222_v47 }
 0x1ae   :  { %v260_v49 = vpop.f32.mrf.mxu3 }
 0x1af   :  { %v261_v50 = vadd.f32 %v297_v48, %v260_v49 }
 0x1b1   :  { %263 = vst [vmem:[#allocation13] sm:$0xf] %v261_v50 }
 0x1b2   :  { %274 = dma.vmem_to_hbm [thread:$0]  %s270_s20, 64, %s272_s22, [#allocation4]  }
 0x1b3   :  { %474 = dma.done.wait [#allocation4], 64  }
 0x1b4   :  { %475 = vsyncadd [#allocation4], 4294967232 }
 0x1b5   :  { %279 = vsyncpa [#allocation3], 1 }
 0x1b6   :  { %280 = vsyncpa [#allocation6], 1 }
 0x1b7   :  { %281 = vsyncpa [#allocation9], 1 }
 0x1b8   :  { %282 = vsyncpa [#allocation12], 1 }
 0x1b9   :  { %283 = vsyncpa [#allocation4], 1 }

</bundles_post_ra>
